<compile_context>
chip_gen: v7x
topology: tpu7x:2x2x1
jax: 0.10.0
libtpu: 0.0.40
codegen_flags: <defaults>
</compile_context>

<pallas_src>
import jax
import jax.numpy as jnp
from jax.experimental import pallas as pl
from jax.experimental.pallas import tpu as pltpu


def _bahdanau_kernel(v_ref, qproj_ref, w1_ref, vw_ref, ctx_ref, attn_ref):
    tb, S, H = v_ref.shape

    values = v_ref[...]                                   # (tb, S, H), storage dtype

    # W1(values): one MXU matmul with M = tb*S rows.  Free view when S % 8 == 0.
    vflat = values.reshape(tb * S, H)
    s1 = jnp.dot(vflat, w1_ref[...],
                 preferred_element_type=jnp.float32)      # (tb*S, U) f32
    s1 = s1.reshape(tb, S, -1)

    # qproj already holds W2(query) + b1 + b2 (hoisted to the wrapper):
    # the kernel only does a cheap VPU broadcast-add.
    t = jnp.tanh(s1 + qproj_ref[...][:, None, :])         # (tb, S, U) f32

    # V(tanh(.)): N=1 matmul replaced by a VPU multiply + lane reduction.
    # V's bias is omitted: adding a constant before softmax leaves attn unchanged.
    score = jnp.sum(t * vw_ref[...], axis=-1)             # (tb, S) f32

    # Softmax over the sequence (lane) axis; divide goes to the EUP reciprocal.
    m = jnp.max(score, axis=-1, keepdims=True)
    e = jnp.exp(score - m)
    denom = jnp.sum(e, axis=-1, keepdims=True)
    attn = e * pl.reciprocal(denom, approx=True)          # (tb, S) f32

    # Lane-dense attention output (S on the last axis).
    attn_ref[...] = attn.astype(attn_ref.dtype)

    # context[b, :] = sum_s attn[b, s] * values[b, s, :]
    # VPU broadcast-multiply + sublane (XLU) reduce; accumulates in f32 via
    # dtype promotion (attn is f32), so no explicit cast of `values` is needed.
    ctx = jnp.sum(attn[:, :, None] * values, axis=1)      # (tb, H) f32
    ctx_ref[...] = ctx.astype(ctx_ref.dtype)


def _vmem_capacity_bytes():
    """Best-effort VMEM capacity query; conservative (v7x-sized) fallback."""
    try:
        cap = int(pltpu.get_tpu_info().vmem_capacity_bytes)
        if cap > 0:
            return cap
    except Exception:
        pass
    return 64 * 1024 * 1024


def _vmem_estimate_bytes(tb, S, H, U, itemsize):
    """Per-step VMEM footprint: double-buffered I/O blocks + f32 intermediates."""
    f32 = 4
    io = 2 * (tb * S * H * itemsize          # values tile (streamed)
              + tb * U * f32                 # hoisted query projection
              + H * U * itemsize             # W1 (resident; counted twice to be safe)
              + 8 * max(U, 128) * f32        # V weight, padded to a (8,128) tile
              + tb * H * itemsize            # context output
              + tb * S * itemsize)           # attention output
    temps = (2 * tb * S * U * f32            # s1 / tanh intermediates
             + tb * S * H * f32              # attn*values product for the ctx reduce
             + 4 * tb * S * f32)             # score / exp / attn / softmax scalars
    return io + temps


def _choose_block_b(B, S, H, U, itemsize, target_steps=4):
    """Pick the batch tile: divides B, sublane-aligned (or the full batch),
    fits a generation-aware VMEM budget (counting f32 intermediates), and —
    when the batch allows — leaves >= target_steps grid steps so the values
    stream is pipelined and both v7x TensorCores get work."""
    budget = min(int(0.6 * _vmem_capacity_bytes()), 96 * 1024 * 1024)
    cands = [tb for tb in range(1, B + 1)
             if B % tb == 0 and (tb == B or tb % 8 == 0)]
    fitting = [tb for tb in cands
               if _vmem_estimate_bytes(tb, S, H, U, itemsize) <= budget]
    if not fitting:
        fitting = [min(cands)]
    for min_steps in (target_steps, 2, 1):
        ok = [tb for tb in fitting if B // tb >= min_steps]
        if ok:
            return max(ok)
    return max(fitting)


def bahdanau_attention(query, values, params, block_b=None):
    """query: (1, B, H), values: (B, S, H).
    Returns (context_vector (B, H), attention_weights (B, S, 1)).
    For best HBM throughput, callers may pass values / W1 in bfloat16; the
    kernel accumulates in f32 regardless."""
    w1, b1, w2, b2, vw, vb = params
    del vb  # V's bias cancels in the softmax; attn/ctx do not depend on it.

    q2d = jnp.squeeze(query, 0)                  # (B, H) (matches torch.squeeze(query, 0))
    B, S, H = values.shape
    U = w1.shape[1]
    itemsize = values.dtype.itemsize

    # Hoisted query projection (one XLA matmul) with both biases folded in.
    qproj = (q2d @ w2 + b1 + b2).astype(jnp.float32)       # (B, U)

    tb = block_b if block_b is not None else _choose_block_b(B, S, H, U, itemsize)
    assert B % tb == 0, "batch tile must divide B"
    grid = (B // tb,)

    # vmem limit sized from the actual estimate (floor 32 MiB, capped below
    # physical capacity so v7x's 64 MiB part is never over-subscribed).
    vmem_limit = int(min(
        max(1.25 * _vmem_estimate_bytes(tb, S, H, U, itemsize), 32 * 1024 * 1024),
        min(int(0.75 * _vmem_capacity_bytes()), 96 * 1024 * 1024)))

    grid_spec = pltpu.PrefetchScalarGridSpec(
        num_scalar_prefetch=0,
        grid=grid,
        in_specs=[
            pl.BlockSpec((tb, S, H), lambda b: (b, 0, 0)),   # values tile (streamed)
            pl.BlockSpec((tb, U), lambda b: (b, 0)),         # hoisted query projection
            pl.BlockSpec((H, U), lambda b: (0, 0)),          # W1^T (resident across steps)
            pl.BlockSpec((1, U), lambda b: (0, 0)),          # V weight (resident)
        ],
        out_specs=[
            pl.BlockSpec((tb, H), lambda b: (b, 0)),         # context vector
            pl.BlockSpec((tb, S), lambda b: (b, 0)),         # attn, lane-dense (S last)
        ],
    )

    ctx, attn2d = pl.pallas_call(
        _bahdanau_kernel,
        grid_spec=grid_spec,
        out_shape=(
            jax.ShapeDtypeStruct((B, H), values.dtype),
            jax.ShapeDtypeStruct((B, S), values.dtype),
        ),
        compiler_params=pltpu.CompilerParams(
            dimension_semantics=("parallel",),
            vmem_limit_bytes=vmem_limit,
        ),
    )(values, qproj, w1, vw)

    # Reshape the lane-dense (B, S) attention slab to the torch layout (B, S, 1).
    return ctx, attn2d[:, :, None]


def init_params(key, units, hidden_size):
    ks = jax.random.split(key, 6)
    scale = 0.1
    w1 = scale * jax.random.normal(ks[0], (hidden_size, units), jnp.float32)   # W1.weight.T
    b1 = scale * jax.random.normal(ks[1], (1, units), jnp.float32)
    w2 = scale * jax.random.normal(ks[2], (hidden_size, units), jnp.float32)   # W2.weight.T
    b2 = scale * jax.random.normal(ks[3], (1, units), jnp.float32)
    vw = scale * jax.random.normal(ks[4], (1, units), jnp.float32)             # V.weight
    vb = scale * jax.random.normal(ks[5], (1, 1), jnp.float32)                 # V.bias
    return (w1, b1, w2, b2, vw, vb)


def reference(query, values, params):
    """Pure-JAX reference mirroring the PyTorch forward (including V's bias)."""
    w1, b1, w2, b2, vw, vb = params
    q = jnp.squeeze(query, 0)                       # (B, H)
    hwt = q[:, None, :]                             # (B, 1, H)
    sum_1 = values @ w1 + b1 + hwt @ w2 + b2        # (B, S, U)
    score = jnp.tanh(sum_1) @ vw.T + vb             # (B, S, 1)
    attn = jax.nn.softmax(score, axis=1)            # (B, S, 1)
    ctx = jnp.sum(attn * values, axis=1)            # (B, H)
    return ctx, attn


if __name__ == "__main__":
    # Small shapes; B=16 so the auto-chosen tile (tb=8) yields a 2-step
    # "parallel" grid (pipelining + v7x megacore path exercised).
    B, S, H, U = 16, 8, 32, 32
    key = jax.random.PRNGKey(0)
    k_q, k_v, k_p = jax.random.split(key, 3)

    query = jax.random.normal(k_q, (1, B, H), jnp.float32)
    values = jax.random.normal(k_v, (B, S, H), jnp.float32)
    params = init_params(k_p, U, H)

    ctx, attn = bahdanau_attention(query, values, params)
    jax.block_until_ready((ctx, attn))

    ctx_ref, attn_ref = reference(query, values, params)
    assert ctx.shape == (B, H) and attn.shape == (B, S, 1)
    # Tolerance accounts for the approximate EUP reciprocal in the softmax.
    assert jnp.allclose(ctx, ctx_ref, atol=2e-3, rtol=2e-3)
    assert jnp.allclose(attn, attn_ref, atol=2e-3, rtol=2e-3)
    print("KERNEL_OK")
</pallas_src>

<mosaic_0001>
module attributes {stable_mosaic.version = 11 : i64} {
  func.func @_bahdanau_kernel(%arg0: i32, %arg1: memref<8x8x32xf32, #tpu.memory_space<vmem>>, %arg2: memref<8x32xf32, #tpu.memory_space<vmem>>, %arg3: memref<32x32xf32, #tpu.memory_space<vmem>>, %arg4: memref<1x32xf32, #tpu.memory_space<vmem>>, %arg5: memref<8x32xf32, #tpu.memory_space<vmem>>, %arg6: memref<8x8xf32, #tpu.memory_space<vmem>>) attributes {dimension_semantics = [#tpu.dimension_semantics<parallel>], iteration_bounds = array<i64: 2>, scalar_prefetch = 0 : i64, scratch_operands = 0 : i64, tpu.core_type = #tpu.core_type<tc>, window_params = [{transform_indices = @transform_0, window_bounds = array<i64: 8, 8, 32>}, {transform_indices = @transform_1, window_bounds = array<i64: 8, 32>}, {pipeline_mode = #tpu.pipeline_mode<synchronous>, transform_indices = @transform_2, window_bounds = array<i64: 32, 32>}, {pipeline_mode = #tpu.pipeline_mode<synchronous>, transform_indices = @transform_3, window_bounds = array<i64: 1, 32>}, {transform_indices = @transform_4, window_bounds = array<i64: 8, 32>}, {transform_indices = @transform_5, window_bounds = array<i64: 8, 8>}]} {
    %c0 = arith.constant 0 : index
    %c0_0 = arith.constant 0 : index
    %c0_1 = arith.constant 0 : index
    %0 = vector.load %arg1[%c0, %c0_0, %c0_1] : memref<8x8x32xf32, #tpu.memory_space<vmem>>, vector<8x8x32xf32>
    %1 = vector.shape_cast %0 : vector<8x8x32xf32> to vector<64x32xf32>
    %c0_2 = arith.constant 0 : index
    %c0_3 = arith.constant 0 : index
    %2 = vector.load %arg3[%c0_2, %c0_3] : memref<32x32xf32, #tpu.memory_space<vmem>>, vector<32x32xf32>
    %cst = arith.constant dense<0.000000e+00> : vector<64x32xf32>
    %3 = tpu.matmul %1, %2, %cst {dimension_numbers = #tpu.dot_dimension_numbers<[1], [0], [0], [1], [0, 0, 1, 1], [], []>} : vector<64x32xf32>, vector<32x32xf32>, vector<64x32xf32> -> vector<64x32xf32>
    %4 = vector.shape_cast %3 : vector<64x32xf32> to vector<8x8x32xf32>
    %c0_4 = arith.constant 0 : index
    %c0_5 = arith.constant 0 : index
    %5 = vector.load %arg2[%c0_4, %c0_5] : memref<8x32xf32, #tpu.memory_space<vmem>>, vector<8x32xf32>
    %6 = vector.shape_cast %5 : vector<8x32xf32> to vector<8x1x32xf32>
    %7 = vector.broadcast %6 : vector<8x1x32xf32> to vector<8x8x32xf32>
    %8 = arith.addf %4, %7 : vector<8x8x32xf32>
    %9 = math.tanh %8 : vector<8x8x32xf32>
    %c0_6 = arith.constant 0 : index
    %c0_7 = arith.constant 0 : index
    %10 = vector.load %arg4[%c0_6, %c0_7] : memref<1x32xf32, #tpu.memory_space<vmem>>, vector<1x32xf32>
    %11 = vector.shape_cast %10 : vector<1x32xf32> to vector<1x1x32xf32>
    %12 = vector.broadcast %11 : vector<1x1x32xf32> to vector<8x8x32xf32>
    %13 = arith.mulf %9, %12 : vector<8x8x32xf32>
    %cst_8 = arith.constant dense<0.000000e+00> : vector<8x8xf32>
    %14 = vector.multi_reduction <add>, %13, %cst_8 [2] : vector<8x8x32xf32> to vector<8x8xf32>
    %cst_9 = arith.constant dense<0xFF800000> : vector<8xf32>
    %15 = vector.multi_reduction <maximumf>, %14, %cst_9 [1] : vector<8x8xf32> to vector<8xf32>
    %16 = vector.shape_cast %15 : vector<8xf32> to vector<8x1xf32>
    %17 = vector.broadcast %16 : vector<8x1xf32> to vector<8x8xf32>
    %18 = arith.subf %14, %17 : vector<8x8xf32>
    %19 = math.exp %18 : vector<8x8xf32>
    %cst_10 = arith.constant dense<0.000000e+00> : vector<8xf32>
    %20 = vector.multi_reduction <add>, %19, %cst_10 [1] : vector<8x8xf32> to vector<8xf32>
    %21 = vector.shape_cast %20 : vector<8xf32> to vector<8x1xf32>
    %22 = tpu.reciprocal %21 {approx = true} : vector<8x1xf32> -> vector<8x1xf32>
    %23 = vector.broadcast %22 : vector<8x1xf32> to vector<8x8xf32>
    %24 = arith.mulf %19, %23 : vector<8x8xf32>
    %c0_11 = arith.constant 0 : index
    %c0_12 = arith.constant 0 : index
    %25 = vector.load %arg6[%c0_11, %c0_12] : memref<8x8xf32, #tpu.memory_space<vmem>>, vector<8x8xf32>
    tpu.vector_store %arg6[%c0_11, %c0_12], %24 {strides = array<i32>} : memref<8x8xf32, #tpu.memory_space<vmem>>, vector<8x8xf32>,
    %26 = vector.shape_cast %24 : vector<8x8xf32> to vector<8x8x1xf32>
    %27 = vector.broadcast %26 : vector<8x8x1xf32> to vector<8x8x32xf32>
    %28 = arith.mulf %27, %0 : vector<8x8x32xf32>
    %cst_13 = arith.constant dense<0.000000e+00> : vector<8x32xf32>
    %29 = vector.multi_reduction <add>, %28, %cst_13 [1] : vector<8x8x32xf32> to vector<8x32xf32>
    %c0_14 = arith.constant 0 : index
    %c0_15 = arith.constant 0 : index
    %30 = vector.load %arg5[%c0_14, %c0_15] : memref<8x32xf32, #tpu.memory_space<vmem>>, vector<8x32xf32>
    tpu.vector_store %arg5[%c0_14, %c0_15], %29 {strides = array<i32>} : memref<8x32xf32, #tpu.memory_space<vmem>>, vector<8x32xf32>,
    return
  }
  func.func @transform_0(%arg0: i32) -> (i32, i32, i32) {
    %c0_i32 = arith.constant 0 : i32
    %c0_i32_0 = arith.constant 0 : i32
    %c0_i32_1 = arith.constant 0 : i32
    return %arg0, %c0_i32, %c0_i32_0 : i32, i32, i32
  }
  func.func @transform_1(%arg0: i32) -> (i32, i32) {
    %c0_i32 = arith.constant 0 : i32
    %c0_i32_0 = arith.constant 0 : i32
    return %arg0, %c0_i32 : i32, i32
  }
  func.func @transform_2(%arg0: i32) -> (i32, i32) {
    %c0_i32 = arith.constant 0 : i32
    %c0_i32_0 = arith.constant 0 : i32
    %c0_i32_1 = arith.constant 0 : i32
    return %c0_i32, %c0_i32_0 : i32, i32
  }
  func.func @transform_3(%arg0: i32) -> (i32, i32) {
    %c0_i32 = arith.constant 0 : i32
    %c0_i32_0 = arith.constant 0 : i32
    %c0_i32_1 = arith.constant 0 : i32
    return %c0_i32, %c0_i32_0 : i32, i32
  }
  func.func @transform_4(%arg0: i32) -> (i32, i32) {
    %c0_i32 = arith.constant 0 : i32
    %c0_i32_0 = arith.constant 0 : i32
    return %arg0, %c0_i32 : i32, i32
  }
  func.func @transform_5(%arg0: i32) -> (i32, i32) {
    %c0_i32 = arith.constant 0 : i32
    %c0_i32_0 = arith.constant 0 : i32
    return %arg0, %c0_i32 : i32, i32
  }
}

</mosaic_0001>

<bundles_post_ra>
// kernel: tpu_custom_call.1
= control target key start
LH: loop header
LB: loop body
LE: loop exit
PB: predicated region body
PF: predicated region fallthrough
CT: control target
= control target key end

     0   :  { %s1971_s0 = inlined_call_operand.hbm [shape: f32[16,8,32], index: 0, kind: input, shape index: {}]   ;;  %s1972_s1 = inlined_call_operand.hbm [shape: f32[16,32], index: 1, kind: input, shape index: {}]   ;;  %s1973_s2 = inlined_call_operand.hbm [shape: f32[32,32], index: 2, kind: input, shape index: {}]   ;;  %s1974_s3 = inlined_call_operand.vmem [shape: f32[1,32], index: 3, kind: input, shape index: {}]   ;;  %s1975_s4 = inlined_call_operand.hbm [shape: f32[16,32], index: 4, kind: output, shape index: {0}]   ;;  %s1976_s5 = inlined_call_operand.vmem [shape: f32[16,8], index: 5, kind: output, shape index: {1}]  }
   0x1   :  { %1981 = sst [smem:[#allocation14_spill]] %s1971_s0 }
   0x2   :  { %1982 = sst [smem:[#allocation15_spill]] %s1973_s2 }
   0x3   :  { %11 = vsyncpa [#allocation3], 0 }
   0x4   :  { %13 = vsyncpa [#allocation3 + $0x1], 0 }
   0x5   :  { %14 = vsyncpa [#allocation6], 0 }
   0x6   :  { %16 = vsyncpa [#allocation6 + $0x1], 0 }
   0x7   :  { %17 = vsyncpa [#allocation4], 0 }
   0x8   :  { %19 = vsyncpa [#allocation4 + $0x1], 0  ;;  %s1532_s18 = smov 0   ;;  %s1534_s19 = smov 0  }
   0x9   :  { %s1536_s20 = smov 0   ;;  %s1538_s21 = smov 0  }
   0xa LB: > { %s1553_s22 = sadd.s32 4294967295, %s1492_s21   ;;  %s1154_s23 = sadd.s32 4294967294, %s1492_s21   ;;  %s1492_s21 = sphi %s1538_s21, %s2005_s21   ;;  %s1488_s20 = sphi %s1536_s20, %s2004_s20   ;;  %s1484_s19 = sphi %s1534_s19, %s2003_s19   ;;  %s1480_s18 = sphi %s1532_s18, %s2002_s18  }
   0xb   : > { %p45_p0 = scmp.ne.s32.totalorder %s1484_s19, %s1480_s18  ;;  %p1977_p1 = scmp.eq.s32.totalorder %s1553_s22, 0 }
   0xc   : > { %p143_p3 = scmp.eq.s32.totalorder %s1154_s23, 1  ;;  %p1155_p5 = scmp.ge.s32.totalorder %s1492_s21, 1 }
   0xd   : > { %p1562_p4 = por %p1977_p1, %p45_p0  ;;  %p176_p7 = scmp.lt.s32.totalorder %s1492_s21, 3 }
   0xe   : > { %p1567_p6 = por %p143_p3, %p45_p0  ;;  %s1494_s27 = smov [#allocation7]  }
   0xf   : > { %s1983_s24 = scalar_select %p1562_p4, 1, 0 }
  0x10   : > { %s1984_s25 = scalar_select %p1567_p6, 1, 0 }
  0x11   : > { %p1572_p8 = pnand %p1155_p5, %p176_p7  ;;  %s188_s28 = sshll.u32 %s1494_s27, 4  ;;  %s1576_s28 = int_to_ptr.vmem [resolvable:$true] %s188_s28 }
  0x12   : > { %s1588_s30 = sadd.s32 1, %s1492_s21   ;;  %s32_s6 = sadd.s32 1, %s1488_s20 }
  0x13   : > { %s1985_s26 = scalar_select %p1572_p8, 1, 0 }
  0x14   : > { %p1237_p9 = pneg %p1572_p8  ;;  %s29_s7 = ssub.s32 %s1492_s21, %s1588_s30 }
  0x15   : > { %s1987_s2 = sld [smem:[#allocation15_spill]] }
  0x16   : > { %p1583_p11 = pnand %p1237_p9, %p1977_p1 }
  0x18   : > { %p1332_p13 = pneg %p1583_p11 }
  0x1b   : > { %s1330_s10 = scalar_lea.hbm %s1987_s2, 512 }
  0x1c   : > { %p1331_p12 = scmp.ne.s32.totalorder %s1987_s2, %s1330_s10  ;;  %p1337_p5 = scmp.lt.u32.totalorder %s1330_s10, %s1987_s2 }
  0x1e   : > { %p1333_p0 = pnand %p1332_p13, %p1331_p12 }
  0x20   : > { %p1334_p3 = pneg %p1333_p0 }
  0x22   : > { %p1339_p7 = pnand %p1337_p5, %p1334_p3 }
  0x24   : > { %1342 = shalt.err (!%p1339_p7)
}
  0x25   : > { %s1343_s15 = scalar_lea.vmem %s1576_s28, 512  ;;  %p1351_p2 = scmp.lt.s32.totalorder %s1576_s28, %s1576_s28 }
  0x26   : > { %p1344_p9 = scmp.ne.s32.totalorder %s1576_s28, %s1343_s15  ;;  %p1352_p6 = scmp.lt.s32.totalorder %s1343_s15, %s1343_s15 }
  0x28   : > { %p1346_p10 = pnand %p1344_p9, %p1332_p13  ;;  %p1353_p4 = por %p1352_p6, %p1351_p2 }
  0x2a   : > { %p1347_p1 = pneg %p1346_p10 }
  0x2c   : > { %p1354_p8 = pnand %p1353_p4, %p1347_p1 }
  0x2e   : > { %1357 = shalt.err (!%p1354_p8)
}
  0x2f   : > { %s1495_s16 = smov 128   ;;  %s1496_s17 = smov 8  }
  0x30   : > { %1240 = dma.hbm_to_vmem [thread:$0]  (!%p1583_p11), %s1987_s2, 512, %s1576_s28, [#allocation6], %s1495_s16, %s1495_s16, %s1496_s17  }
  0x31   : > { %p30_p1 = scmp.eq.s32.totalorder %s29_s7, 0  ;;  %p39_p2 = scmp.ne.s32.totalorder %s1488_s20, %s1484_s19 }
  0x32   : > { %p40_p4 = scmp.eq.s32.totalorder %s1492_s21, 0  ;;  %p1253_p6 = scmp.lt.s32.totalorder %s1492_s21, 2 }
  0x33   : > { %s1622_s8 = scalar_select %p30_p1, %s1488_s20, %s32_s6  }
  0x34   : > { %p41_p8 = por %p40_p4, %p39_p2  ;;  %p1989_p10 = scmp.eq.s32.totalorder %s1553_s22, 1 }
  0x35   : > { %1988 = sst [smem:[#allocation13_spill]] %s1622_s8  ;;  %s1631_s29 = sand.u32 1, %s1488_s20  }
  0x36   : > { %p1626_p12 = por %p1989_p10, %p39_p2  ;;  %s1182_s10 = sshll.u32 %s1492_s21, 10 }
  0x37   : > { %s1158_s11 = sshll.u32 %s1631_s29, 6  ;;  %s1991_s0 = sld [smem:[#allocation14_spill]] }
  0x38   : > { %s1990_s9 = scalar_select %p1626_p12, 1, 0 }
  0x39   : > { %s209_s6 = scalar_lea.vmem [#allocation2], %s1158_s11  ;;  %p1640_p11 = pnand %p1253_p6, %p41_p8 }
  0x3a   : > { %s216_s13 = sshll.u32 %s209_s6, 4  ;;  %s206_s23 = scalar_lea.sflag [#allocation3], %s1631_s29  ;;  %s1644_s13 = int_to_ptr.vmem [resolvable:$true] %s216_s13 }
  0x3b   : > { %p1360_p0 = pneg %p1640_p11 }
  0x3d   : > { %s1638_s7 = scalar_lea.hbm %s1991_s0, %s1182_s10  ;;  %s1363_s28 = scalar_lea.hbm %s1991_s0, 2048 }
  0x3e   : > { %s1358_s27 = scalar_lea.hbm %s1638_s7, 1024  ;;  %p1364_p7 = scmp.lt.u32.totalorder %s1638_s7, %s1991_s0 }
  0x3f   : > { %p1359_p13 = scmp.ne.s32.totalorder %s1638_s7, %s1358_s27  ;;  %p1365_p9 = scmp.lt.u32.totalorder %s1363_s28, %s1358_s27 }
  0x40   : > { %p1367_p2 = scmp.lt.u32.totalorder %s1358_s27, %s1638_s7 }
  0x41   : > { %p1361_p3 = pnand %p1360_p0, %p1359_p13  ;;  %p1366_p1 = por %p1365_p9, %p1364_p7 }
  0x43   : > { %p1362_p5 = pneg %p1361_p3  ;;  %p1368_p4 = por %p1367_p2, %p1366_p1 }
  0x45   : > { %p1369_p6 = pnand %p1368_p4, %p1362_p5 }
  0x47   : > { %1372 = shalt.err (!%p1369_p6)
}
  0x48   : > { %s1373_s15 = scalar_lea.vmem %s1644_s13, 1024  ;;  %s1497_s10 = smov [#allocation2]  }
  0x49   : > { %p1374_p8 = scmp.ne.s32.totalorder %s1644_s13, %s1373_s15  ;;  %s1378_s11 = sshll.u32 %s1497_s10, 4  ;;  %s1379_s11 = int_to_ptr.vmem [resolvable:$false] %s1378_s11 }
  0x4a   : > { %s1380_s12 = scalar_lea.vmem %s1379_s11, 2048  ;;  %p1381_p3 = scmp.lt.s32.totalorder %s1644_s13, %s1379_s11 }
  0x4b   : > { %p1376_p10 = pnand %p1374_p8, %p1360_p0  ;;  %p1382_p7 = scmp.lt.s32.totalorder %s1380_s12, %s1373_s15 }
  0x4d   : > { %p1377_p13 = pneg %p1376_p10  ;;  %p1383_p9 = por %p1382_p7, %p1381_p3 }
  0x4f   : > { %p1384_p1 = pnand %p1383_p9, %p1377_p13 }
  0x51   : > { %1387 = shalt.err (!%p1384_p1)
}
  0x52   : > { %1244 = dma.hbm_to_vmem [thread:$0]  (!%p1640_p11), %s1638_s7, 1024, %s1644_s13, %s206_s23, %s1495_s16, %s1495_s16, %s1496_s17  }
  0x53   : > { %s1161_s27 = sshll.u32 %s1631_s29, 3  ;;  %s1162_s28 = sshll.u32 %s1492_s21, 7 }
  0x54   : > { %s1683_s10 = scalar_lea.hbm %s1972_s1, %s1162_s28  ;;  %s230_s11 = scalar_lea.vmem [#allocation5], %s1161_s27 }
  0x55   : > { %s237_s12 = sshll.u32 %s230_s11, 4  ;;  %s1993_s0 = sand.u32 1, %s1492_s21   ;;  %s238_s12 = int_to_ptr.vmem [resolvable:$true] %s237_s12 }
  0x56   : > { %s227_s2 = scalar_lea.sflag [#allocation6], %s1993_s0  ;;  %s1388_s8 = scalar_lea.hbm %s1683_s10, 128 }
  0x57   : > { %p1389_p5 = scmp.ne.s32.totalorder %s1683_s10, %s1388_s8  ;;  %s1393_s29 = scalar_lea.hbm %s1972_s1, 256 }
  0x58   : > { %p1394_p6 = scmp.lt.u32.totalorder %s1683_s10, %s1972_s1  ;;  %p1395_p8 = scmp.lt.u32.totalorder %s1393_s29, %s1388_s8 }
  0x59   : > { %p1391_p2 = pnand %p1389_p5, %p1360_p0  ;;  %p1397_p13 = scmp.lt.u32.totalorder %s1388_s8, %s1683_s10 }
  0x5a   : > { %p1396_p10 = por %p1395_p8, %p1394_p6 }
  0x5b   : > { %p1392_p4 = pneg %p1391_p2 }
  0x5c   : > { %p1398_p3 = por %p1397_p13, %p1396_p10 }
  0x5e   : > { %p1399_p7 = pnand %p1398_p3, %p1392_p4 }
  0x60   : > { %1402 = shalt.err (!%p1399_p7)
}
  0x61   : > { %s1403_s0 = scalar_lea.vmem %s238_s12, 128  ;;  %s1498_s23 = smov [#allocation5]  }
  0x62   : > { %p1404_p9 = scmp.ne.s32.totalorder %s238_s12, %s1403_s0  ;;  %s1408_s27 = sshll.u32 %s1498_s23, 4  ;;  %s1409_s27 = int_to_ptr.vmem [resolvable:$false] %s1408_s27 }
  0x63   : > { %s1410_s28 = scalar_lea.vmem %s1409_s27, 256  ;;  %p1411_p2 = scmp.lt.s32.totalorder %s238_s12, %s1409_s27 }
  0x64   : > { %p1406_p1 = pnand %p1404_p9, %p1360_p0  ;;  %p1412_p12 = scmp.lt.s32.totalorder %s1410_s28, %s1403_s0 }
  0x66   : > { %p1407_p5 = pneg %p1406_p1  ;;  %p1413_p6 = por %p1412_p12, %p1411_p2 }
  0x68   : > { %p1414_p8 = pnand %p1413_p6, %p1407_p5 }
  0x6a   : > { %1417 = shalt.err (!%p1414_p8)
}
  0x6b   : > { %1247 = dma.hbm_to_vmem [thread:$0]  (!%p1640_p11), %s1683_s10, 128, %s238_s12, %s227_s2  }
  0x6c   : > { %p1994_p4 = scmp.ne.s32.totalorder %s1985_s26, 0 }
  0x6d   : > { %s1709_s8 = sand.u32 (!%p1994_p4), 1, %s1484_s19   ;;  %p1995_p12 = scmp.ne.s32.totalorder (!%p1994_p4), %s1983_s24, 0 }
  0x6e   : > { %246 = sbr.rel (%p1994_p4) target bundleno = 1183 (0x49f), region = 36  ;;  %s1164_s15 = sshll.u32 (!%p1994_p4), %s1709_s8, 6 }
  0x6f   : > { %s249_s6 = scalar_lea.sflag (!%p1994_p4), [#allocation3], %s1709_s8  ;;  %s1713_s11 = scalar_lea.vmem (!%p1994_p4), [#allocation2], %s1164_s15 }
  0x75   : > { %1463 = dma.done.wait (%p1995_p12), %s249_s6, 1024  }
  0x76   : > { %1465 = vsyncadd (%p1995_p12), %s249_s6, 4294966272  ;;  %s257_s2 = sand.u32 1, %s1553_s22   ;;  %s1165_s26 = sshll.u32 %s1709_s8, 3 }
  0x77   : > { %s258_s14 = scalar_lea.sflag [#allocation6], %s257_s2  ;;  %s1723_s10 = scalar_lea.vmem [#allocation5], %s1165_s26 }
  0x78   : > { %1467 = dma.done.wait (%p1995_p12), %s258_s14, 128  }
  0x79   : > { %1469 = vsyncadd (%p1995_p12), %s258_s14, 4294967168  ;;  %p1996_p11 = scmp.eq.s32.totalorder %s1553_s22, 0 }
  0x7b   : > { %1471 = dma.done.wait (%p1996_p11), [#allocation6], 512   ;;  %p1997_p0 = pmov %p1996_p11 }
  0x7c   : > { %vm318_vm0 = vcmask 261120   ;;  %v314_v0 = vld [vmem:[#allocation7] sm:$0xff]  ;;  %v315_v1 = vld [vmem:[#allocation7 + $0x8] sm:$0xff]  ;;  %v316_v2 = vld [vmem:[#allocation7 + $0x10] sm:$0xff]  ;;  %v1499_v14 = vmov 1966171168   ;;  %v454_v16 = vlaneseq }
  0x7d   : > { %1473 = vsyncadd (%p1997_p0), [#allocation6], 4294966784  ;;  %v1215_v3 = vpack.c.bf16 %v315_v1, %v314_v0  ;;  %v317_v4 = vld [vmem:[#allocation7 + $0x18] sm:$0xff]  ;;  %v1734_v5 = vld [vmem:[%s1713_s11] sm:$0xff]  ;;  %v452_v15 = vunpack.c.l.s4 %v1499_v14  ;;  %vm636_vm1 = vcmask 1041409   ;;  %vm638_vm2 = vcmask 1042434  }
  0x7e   : > { %v1219_v6 = vpack.c.bf16 %v317_v4, %v316_v2  ;;  %1203 = vmatprep.mubr.msk.f32.mxu0 %vm318_vm0, %v1734_v5  ;;  %v1739_v7 = vld [vmem:[%s1713_s11 + $0x20] sm:$0xff]  ;;  %v1744_v8 = vld [vmem:[%s1713_s11 + $0x8] sm:$0xff]  ;;  %v1750_v10 = vld [vmem:[%s1713_s11 + $0x10] sm:$0xff]  ;;  %v1774_v18 = vshrl.u32 %v454_v16, 7  ;;  %vm640_vm3 = vcmask 1043459   ;;  %vm642_vm4 = vcmask 1044484  }
  0x7f   : > { %1216 = vmatprep.subr.bf16.mxu0 %v1215_v3  ;;  %1223 = vmatprep.subr.bf16.mxu1 %v1215_v3  ;;  %v1747_v9 = vld [vmem:[%s1713_s11 + $0x28] sm:$0xff]  ;;  %v1753_v11 = vld [vmem:[%s1713_s11 + $0x30] sm:$0xff]  ;;  %v1762_v12 = vld [vmem:[%s1713_s11 + $0x18] sm:$0xff]  ;;  %v453_v17 = vunpack.c.0.s8 %v452_v15  ;;  %vm644_vm5 = vcmask 1045509   ;;  %vm646_vm6 = vcmask 1046534   ;;  %vm648_vm7 = vcmask 1047559  }
  0x80   : > { %1218 = vmatpush3.bf16.msra.mxu0 %v1215_v3  ;;  %1225 = vmatpush3.bf16.msra.mxu1 %v1215_v3  ;;  %v1767_v13 = vld [vmem:[%s1713_s11 + $0x38] sm:$0xff]  ;;  %v448_v20 = vld [vmem:[%s1723_s10] sm:$0xff]  ;;  %v1779_v26 = vsub.s32 0, %v1774_v18  ;;  %vm651_vm8 = vcmask 64512   ;;  %p302_p10 = scmp.lt.s32.totalorder %s1553_s22, 1  ;;  %s1179_s0 = sshll.u32 %s1553_s22, 7 }
  0x81   : > { %1220 = vmatprep.subr.bf16.mxu0 %v1219_v6  ;;  %1224 = vmatprep.subr.bf16.mxu1 %v1219_v6  ;;  %v456_v19 = vsub.s32 %v453_v17, %v1774_v18  ;;  %v450_v22 = vcombine.high %v448_v20, %v448_v20  ;;  %v1177_v59 = vld [vmem:[%s1974_s3] ss:$0 sm:$0xff]  ;;  %s294_s23 = scalar_lea.vmem [#allocation8], %s1165_s26  ;;  %s1925_s6 = scalar_lea.hbm %s1975_s4, %s1179_s0 }
  0x82   : > { %1209 = vmatprep.mubr.msk.f32.mxu1 %vm318_vm0, %v1739_v7  ;;  %s1889_s16 = scalar_select %p302_p10, %s1553_s22, 1 }
  0x83   : > { %v457_v21 = vrot.slane %v448_v20, %v456_v19  ;;  %v464_v24 = vrot.slane %v450_v22, %v456_v19  ;;  %s1025_s27 = sshll.u32 %s294_s23, 4  ;;  %s1008_s22 = scalar_lea.sflag [#allocation4], %s1709_s8  ;;  %s1927_s27 = int_to_ptr.vmem [resolvable:$true] %s1025_s27 }
  0x84   : > { %1222 = vmatpush3.bf16.msra.mxu0 %v1219_v6  ;;  %1226 = vmatpush3.bf16.msra.mxu1 %v1219_v6  ;;  %s1168_s17 = sshll.u32 %s1889_s16, 3  ;;  %s1418_s11 = scalar_lea.vmem %s1927_s27, 128 }
  0x85   : > { %v465_v23 = vcombine.high %v457_v21, %v457_v21  ;;  %v473_v27 = vrot.slane %v457_v21, %v456_v19  ;;  %v480_v28 = vrot.slane %v464_v24, %v456_v19  ;;  %v466_v29 = vcombine.high %v464_v24, %v464_v24  ;;  %s305_s13 = scalar_lea.vmem %s1976_s5, %s1168_s17  ;;  %p1419_p13 = scmp.ne.s32.totalorder %s1927_s27, %s1418_s11 }
  0x86   : > { %p1998_p3 = scmp.ne.s32.totalorder %s1990_s9, 0  ;;  %s1501_s2 = smov [#allocation8]  }
  0x87   : > { %1204 = vmatmul.mubr.msk.f32.vlgmr.msra.gmra.mrb[0].mxu0 %vm318_vm0, %v1744_v8  ;;  %1210 = vmatmul.mubr.msk.f32.vlgmr.msra.gmra.mrb[0].mxu1 %vm318_vm0, %v1747_v9  ;;  %v487_v25 = vrot.slane %v465_v23, %v456_v19  ;;  %v502_v32 = vrot.slane %v473_v27, %v1779_v26  ;;  %v495_v33 = vcombine.high %v473_v27, %v473_v27  ;;  %s1422_s26 = sshll.u32 %s1501_s2, 4  ;;  %s1423_s26 = int_to_ptr.vmem [resolvable:$false] %s1422_s26 }
  0x88   : > { %1206 = vmatprep.mubr.msk.f32.mxu0 %vm318_vm0, %v1750_v10  ;;  %1212 = vmatprep.mubr.msk.f32.mxu1 %vm318_vm0, %v1753_v11  ;;  %v518_v34 = vrot.slane %v480_v28, %v1779_v26  ;;  %v496_v35 = vcombine.high %v480_v28, %v480_v28  ;;  %v494_v36 = vrot.slane %v466_v29, %v456_v19  ;;  %p1420_p7 = pnand %p1419_p13, %p1998_p3  ;;  %s1424_s14 = scalar_lea.vmem %s1423_s26, 256 }
  0x89   : > { %v506_v30 = vrot.slane %v487_v25, %v1779_v26  ;;  %v497_v31 = vcombine.high %v487_v25, %v487_v25  ;;  %v510_v44 = vrot.slane %v495_v33, %v1779_v26  ;;  %p1425_p1 = scmp.lt.s32.totalorder %s1927_s27, %s1423_s26  ;;  %p1426_p5 = scmp.lt.s32.totalorder %s1424_s14, %s1418_s11 }
  0x8a   : > { %v526_v46 = vrot.slane %v496_v35, %v1779_v26  ;;  %v522_v47 = vrot.slane %v494_v36, %v1779_v26  ;;  %v498_v48 = vcombine.high %v494_v36, %v494_v36  ;;  %p1421_p9 = pneg %p1420_p7 }
  0x8b   : > { %1207 = vmatmul.mubr.msk.f32.gmra.mrb[2].mxu0 %vm318_vm0, %v1762_v12  ;;  %1213 = vmatmul.mubr.msk.f32.gmra.mrb[2].mxu1 %vm318_vm0, %v1767_v13  ;;  %v514_v41 = vrot.slane %v497_v31, %v1779_v26  ;;  %v603_v31 = vand.u32 127, %v454_v16  ;;  %p1427_p2 = por %p1426_p5, %p1425_p1 }
  0x8c   : > { %v530_v57 = vrot.slane %v498_v48, %v1779_v26 }
  0x8d   : > { %v1802_v33 = vsub.s32 %v603_v31, %v1774_v18  ;;  %p1428_p6 = pnand %p1427_p2, %p1421_p9 }
 0x15a   : > { %v1205_v37 = vpop.f32.mrb[0].mxu0  ;;  %v1211_v38 = vpop.f32.mrb[0].mxu1 }
 0x15b   : > { %v540_v39 = vadd.f32 %v1205_v37, %v506_v30  ;;  %v409_v40 = vpop.f32.mrb[1].mxu0  ;;  %v429_v42 = vpop.f32.mrb[1].mxu1  ;;  %v544_v56 = vadd.f32 %v1211_v38, %v522_v47 }
 0x15c   : > { %v539_v43 = vadd.f32 %v502_v32, %v409_v40  ;;  %v543_v45 = vadd.f32 %v518_v34, %v429_v42 }
 0x15d   : > { %1296 = vtanh.f32 %v540_v39 }
 0x15e   : > { %1298 = vtanh.f32 %v539_v43  ;;  %v1208_v49 = vpop.f32.mrb[2].mxu0  ;;  %v1214_v50 = vpop.f32.mrb[2].mxu1 }
 0x15f   : > { %v542_v51 = vadd.f32 %v1208_v49, %v514_v41  ;;  %v419_v52 = vpop.f32.mrb[3].mxu0  ;;  %v439_v53 = vpop.f32.mrb[3].mxu1  ;;  %1300 = vtanh.f32 %v543_v45  ;;  %v546_v58 = vadd.f32 %v1214_v50, %v530_v57  ;;  %v662_v57 = vsub.s32 1, %v1774_v18 }
 0x160   : > { %v541_v54 = vadd.f32 %v510_v44, %v419_v52  ;;  %v545_v55 = vadd.f32 %v526_v46, %v439_v53 }
 0x161   : > { %1302 = vtanh.f32 %v542_v51 }
 0x162   : > { %1304 = vtanh.f32 %v541_v54 }
 0x163   : > { %1306 = vtanh.f32 %v545_v55 }
 0x164   : > { %1308 = vtanh.f32 %v544_v56  ;;  %v1500_v56 = vmov 0  }
 0x165   : > { %1310 = vtanh.f32 %v546_v58  ;;  %1294 = vset.pattern.permute.xlu0 %v1500_v56  ;;  %1293 = vset.pattern.permute.xlu1 %v1500_v56  ;;  %v666_v58 = vsub.s32 2, %v1774_v18 }
 0x167   : > { %v1297_v60 = vpop.eup %1296 }
 0x168   : > { %v1299_v61 = vpop.eup %1298  ;;  %v563_v62 = vmul.f32 %v1297_v60, %v1177_v59 }
 0x169   : > { %v1301_v63 = vpop.eup %1300  ;;  %v562_v1 = vmul.f32 %v1299_v61, %v1177_v59 }
 0x16a   : > { %v573_v0 = vsel %vm318_vm0, %v563_v62, 0.0  ;;  %v566_v6 = vmul.f32 %v1301_v63, %v1177_v59 }
 0x16b   : > { %v1303_v2 = vpop.eup %1302  ;;  %574 = vadd.xlane.f32.xlu0 %v573_v0  ;;  %v570_v15 = vsel %vm318_vm0, %v562_v1, 0.0  ;;  %v674_v0 = vsub.s32 4, %v1774_v18 }
 0x16c   : > { %v1305_v3 = vpop.eup %1304  ;;  %v565_v4 = vmul.f32 %v1303_v2, %v1177_v59  ;;  %v582_v21 = vsel %vm318_vm0, %v566_v6, 0.0 }
 0x16d   : > { %v1307_v14 = vpop.eup %1306  ;;  %v564_v19 = vmul.f32 %v1305_v3, %v1177_v59 }
 0x16e   : > { %v579_v17 = vsel %vm318_vm0, %v565_v4, 0.0  ;;  %v1309_v20 = vpop.eup %1308  ;;  %v568_v22 = vmul.f32 %v1307_v14, %v1177_v59 }
 0x16f   : > { %571 = vadd.xlane.f32.xlu0 %v570_v15  ;;  %580 = vadd.xlane.f32.xlu1 %v579_v17  ;;  %v576_v23 = vsel %vm318_vm0, %v564_v19, 0.0  ;;  %v567_v24 = vmul.f32 %v1309_v20, %v1177_v59  ;;  %v1311_v25 = vpop.eup %1310  ;;  %v678_v15 = vsub.s32 5, %v1774_v18 }
 0x170   : > { %v588_v27 = vsel %vm318_vm0, %v568_v22, 0.0  ;;  %v569_v29 = vmul.f32 %v1311_v25, %v1177_v59  ;;  %v670_v59 = vsub.s32 3, %v1774_v18  ;;  %v686_v25 = vsub.s32 7, %v1774_v18 }
 0x171   : > { %v585_v28 = vsel %vm318_vm0, %v567_v24, 0.0 }
 0x172   : > { %v591_v30 = vsel %vm318_vm0, %v569_v29, 0.0 }
 0x173   : > { %577 = vadd.xlane.f32.xlu1 %v576_v23  ;;  %583 = vadd.xlane.f32.xlu0 %v582_v21  ;;  %v682_v21 = vsub.s32 6, %v1774_v18 }
 0x177   : > { %586 = vadd.xlane.f32.xlu1 %v585_v28  ;;  %589 = vadd.xlane.f32.xlu0 %v588_v27 }
 0x17b   : > { %592 = vadd.xlane.f32.xlu1 %v591_v30 }
 0x1f8   : > { %v575_v32 = vpop.xlane.xlu0 %574 }
 0x1f9   : > { %v611_v37 = vrot.slane %v575_v32, %v1802_v33 }
 0x1fc   : > { %v572_v34 = vpop.xlane.xlu0 %571  ;;  %v581_v35 = vpop.xlane.xlu1 %580 }
 0x1fd   : > { %v607_v36 = vrot.slane %v572_v34, %v1802_v33  ;;  %v619_v42 = vrot.slane %v581_v35, %v1802_v33 }
 0x1ff   : > { %v637_v16 = vsel %vm636_vm1, %v611_v37, %v607_v36 }
 0x200   : > { %v578_v38 = vpop.xlane.xlu1 %577  ;;  %v584_v39 = vpop.xlane.xlu0 %583 }
 0x201   : > { %v615_v40 = vrot.slane %v578_v38, %v1802_v33  ;;  %v623_v41 = vrot.slane %v584_v39, %v1802_v33 }
 0x203   : > { %v639_v43 = vsel %vm638_vm2, %v615_v40, %v637_v16 }
 0x204   : > { %v641_v44 = vsel %vm640_vm3, %v619_v42, %v639_v43  ;;  %v587_v45 = vpop.xlane.xlu1 %586  ;;  %v590_v46 = vpop.xlane.xlu0 %589 }
 0x205   : > { %v643_v47 = vsel %vm642_vm4, %v623_v41, %v641_v44  ;;  %v627_v48 = vrot.slane %v587_v45, %v1802_v33  ;;  %v631_v49 = vrot.slane %v590_v46, %v1802_v33 }
 0x207   : > { %v645_v50 = vsel %vm644_vm5, %v627_v48, %v643_v47 }
 0x208   : > { %v593_v51 = vpop.xlane.xlu1 %592  ;;  %v647_v53 = vsel %vm646_vm6, %v631_v49, %v645_v50 }
 0x209   : > { %v635_v52 = vrot.slane %v593_v51, %v1802_v33 }
 0x20b   : > { %v649_v54 = vsel %vm648_vm7, %v635_v52, %v647_v53 }
 0x20c   : > { %v652_v55 = vsel %vm651_vm8, %v649_v54, -inf }
 0x20d   : > { %653 = vmax.xlane.f32.xlu0 %v652_v55 }
 0x29a   : > { %v654_v60 = vpop.xlane.xlu0 %653 }
 0x29b   : > { %v659_v61 = vrot.slane %v654_v60, %v1779_v26  ;;  %v663_v62 = vrot.slane %v654_v60, %v662_v57  ;;  %v667_v63 = vrot.slane %v654_v60, %v666_v58  ;;  %v671_v1 = vrot.slane %v654_v60, %v670_v59 }
 0x29c   : > { %v675_v17 = vrot.slane %v654_v60, %v674_v0  ;;  %v679_v22 = vrot.slane %v654_v60, %v678_v15  ;;  %v683_v27 = vrot.slane %v654_v60, %v682_v21 }
 0x29d   : > { %v696_v2 = vsub.f32 %v572_v34, %v659_v61  ;;  %v697_v3 = vsub.f32 %v575_v32, %v663_v62  ;;  %v698_v4 = vsub.f32 %v578_v38, %v667_v63  ;;  %v699_v19 = vsub.f32 %v581_v35, %v671_v1 }
 0x29e   : > { %v700_v23 = vsub.f32 %v584_v39, %v675_v17  ;;  %v701_v28 = vsub.f32 %v587_v45, %v679_v22  ;;  %v687_v32 = vrot.slane %v654_v60, %v686_v25  ;;  %v702_v34 = vsub.f32 %v590_v46, %v683_v27 }
 0x29f   : > { %v704_v6 = vmul.f32 1.442695, %v696_v2  ;;  %v706_v14 = vmul.f32 1.442695, %v697_v3  ;;  %v708_v20 = vmul.f32 1.442695, %v698_v4 }
 0x2a0   : > { %v710_v24 = vmul.f32 1.442695, %v699_v19  ;;  %v712_v29 = vmul.f32 1.442695, %v700_v23  ;;  %v714_v35 = vmul.f32 1.442695, %v701_v28  ;;  %v703_v37 = vsub.f32 %v593_v51, %v687_v32 }
 0x2a1   : > { %1312 = vpow2.f32 %v704_v6  ;;  %v716_v38 = vmul.f32 1.442695, %v702_v34 }
 0x2a2   : > { %1314 = vpow2.f32 %v706_v14  ;;  %v718_v40 = vmul.f32 1.442695, %v703_v37 }
 0x2a3   : > { %1316 = vpow2.f32 %v708_v20 }
 0x2a4   : > { %1318 = vpow2.f32 %v710_v24 }
 0x2a5   : > { %1320 = vpow2.f32 %v712_v29 }
 0x2a6   : > { %1322 = vpow2.f32 %v714_v35 }
 0x2a7   : > { %1324 = vpow2.f32 %v716_v38 }
 0x2a8   : > { %1326 = vpow2.f32 %v718_v40 }
 0x2ab   : > { %v1313_v30 = vpop.eup %1312 }
 0x2ac   : > { %v1315_v31 = vpop.eup %1314  ;;  %729 = vperm.xlu1 %1293, %v1313_v30  }
 0x2ad   : > { %732 = vperm.xlu0 %1294, %v1315_v31   ;;  %v1317_v36 = vpop.eup %1316 }
 0x2ae   : > { %v1319_v39 = vpop.eup %1318 }
 0x2af   : > { %v1321_v41 = vpop.eup %1320 }
 0x2b0   : > { %735 = vperm.xlu1 %1293, %v1317_v36   ;;  %v1323_v16 = vpop.eup %1322 }
 0x2b1   : > { %v1325_v42 = vpop.eup %1324 }
 0x2b2   : > { %v1327_v43 = vpop.eup %1326 }
 0x2b4   : > { %738 = vperm.xlu1 %1293, %v1319_v39  }
 0x2b8   : > { %741 = vperm.xlu1 %1293, %v1321_v41  }
 0x2bc   : > { %744 = vperm.xlu1 %1293, %v1323_v16  }
 0x2c0   : > { %747 = vperm.xlu1 %1293, %v1325_v42  }
 0x2c4   : > { %750 = vperm.xlu1 %1293, %v1327_v43  }
 0x32b   : > { %v730_v44 = vpop.permute.xlu1 %729 }
 0x32c   : > { %v733_v48 = vpop.permute.xlu0 %732  ;;  %v755_v51 = vrot.slane %v730_v44, %v1802_v33 }
 0x32d   : > { %v759_v50 = vrot.slane %v733_v48, %v1802_v33 }
 0x32f   : > { %v736_v45 = vpop.permute.xlu1 %735  ;;  %v784_v56 = vsel %vm636_vm1, %v759_v50, %v755_v51 }
 0x330   : > { %v763_v52 = vrot.slane %v736_v45, %v1802_v33 }
 0x332   : > { %v785_v61 = vsel %vm638_vm2, %v763_v52, %v784_v56 }
 0x333   : > { %v739_v46 = vpop.permute.xlu1 %738 }
 0x334   : > { %v767_v53 = vrot.slane %v739_v46, %v1802_v33 }
 0x336   : > { %v786_v63 = vsel %vm640_vm3, %v767_v53, %v785_v61 }
 0x337   : > { %v742_v47 = vpop.permute.xlu1 %741 }
 0x338   : > { %v771_v54 = vrot.slane %v742_v47, %v1802_v33 }
 0x33a   : > { %v787_v1 = vsel %vm642_vm4, %v771_v54, %v786_v63 }
 0x33b   : > { %v745_v49 = vpop.permute.xlu1 %744 }
 0x33c   : > { %v775_v60 = vrot.slane %v745_v49, %v1802_v33 }
 0x33e   : > { %v788_v3 = vsel %vm644_vm5, %v775_v60, %v787_v1 }
 0x33f   : > { %v748_v55 = vpop.permute.xlu1 %747 }
 0x340   : > { %v779_v62 = vrot.slane %v748_v55, %v1802_v33 }
 0x342   : > { %v789_v6 = vsel %vm646_vm6, %v779_v62, %v788_v3 }
 0x343   : > { %v751_v2 = vpop.permute.xlu1 %750 }
 0x344   : > { %v783_v4 = vrot.slane %v751_v2, %v1802_v33 }
 0x346   : > { %v790_v14 = vsel %vm648_vm7, %v783_v4, %v789_v6 }
 0x347   : > { %v792_v17 = vsel %vm651_vm8, %v790_v14, 0.0 }
 0x348   : > { %793 = vadd.xlane.f32.xlu1 %v792_v17 }
 0x3d5   : > { %v794_v19 = vpop.xlane.xlu1 %793 }
 0x3d6   : > { %1328 = vrcp.f32 %v794_v19 }
 0x3e0   : > { %v1329_v20 = vpop.eup %1328 }
 0x3e1   : > { %v800_v22 = vrot.slane %v1329_v20, %v1779_v26  ;;  %v804_v24 = vrot.slane %v1329_v20, %v662_v57  ;;  %v808_v28 = vrot.slane %v1329_v20, %v666_v58  ;;  %v812_v32 = vrot.slane %v1329_v20, %v670_v59 }
 0x3e2   : > { %v816_v35 = vrot.slane %v1329_v20, %v674_v0  ;;  %v820_v57 = vrot.slane %v1329_v20, %v678_v15  ;;  %v824_v58 = vrot.slane %v1329_v20, %v682_v21  ;;  %v828_v59 = vrot.slane %v1329_v20, %v686_v25 }
 0x3e3   : > { %v837_v23 = vmul.f32 %v1313_v30, %v800_v22  ;;  %v838_v27 = vmul.f32 %v1315_v31, %v804_v24  ;;  %v839_v29 = vmul.f32 %v1317_v36, %v808_v28  ;;  %v840_v34 = vmul.f32 %v1319_v39, %v812_v32 }
 0x3e4   : > { %v841_v26 = vmul.f32 %v1321_v41, %v816_v35  ;;  %v842_v30 = vmul.f32 %v1323_v16, %v820_v57  ;;  %v843_v31 = vmul.f32 %v1325_v42, %v824_v58  ;;  %v844_v36 = vmul.f32 %v1327_v43, %v828_v59 }
 0x3e5   : > { %854 = vperm.xlu0 %1294, %v837_v23  }
 0x3e9   : > { %857 = vperm.xlu0 %1294, %v838_v27  }
 0x3ed   : > { %860 = vperm.xlu0 %1294, %v839_v29  }
 0x3f1   : > { %863 = vperm.xlu0 %1294, %v840_v34  }
 0x3f5   : > { %866 = vperm.xlu0 %1294, %v841_v26  }
 0x3f9   : > { %869 = vperm.xlu0 %1294, %v842_v30  }
 0x3fd   : > { %872 = vperm.xlu0 %1294, %v843_v31  }
 0x401   : > { %875 = vperm.xlu0 %1294, %v844_v36  }
 0x464   : > { %v855_v37 = vpop.permute.xlu0 %854 }
 0x465   : > { %v926_v39 = vmul.f32 %v855_v37, %v1734_v5  ;;  %v880_v54 = vrot.slane %v855_v37, %v1802_v33 }
 0x467   : > { %v934_v41 = vsel %vm318_vm0, %v926_v39, 0.0 }
 0x468   : > { %v858_v0 = vpop.permute.xlu0 %857  ;;  %v935_v43 = vrot.slane %v934_v41, 4 }
 0x469   : > { %v927_v38 = vmul.f32 %v858_v0, %v1744_v8 }
 0x46a   : > { %v936_v47 = vadd.f32 %v935_v43, %v934_v41 }
 0x46b   : > { %v941_v21 = vsel %vm318_vm0, %v927_v38, 0.0 }
 0x46c   : > { %v861_v15 = vpop.permute.xlu0 %860  ;;  %v942_v42 = vrot.slane %v941_v21, 4 }
 0x46d   : > { %v928_v40 = vmul.f32 %v861_v15, %v1750_v10  ;;  %v888_v56 = vrot.slane %v861_v15, %v1802_v33 }
 0x46e   : > { %v943_v10 = vadd.f32 %v942_v42, %v941_v21 }
 0x46f   : > { %v948_v18 = vsel %vm318_vm0, %v928_v40, 0.0 }
 0x470   : > { %v864_v25 = vpop.permute.xlu0 %863  ;;  %v949_v44 = vrot.slane %v948_v18, 4  ;;  %v944_v55 = vrot.slane %v943_v10, 2 }
 0x471   : > { %v929_v16 = vmul.f32 %v864_v25, %v1762_v12  ;;  %v884_v12 = vrot.slane %v858_v0, %v1802_v33  ;;  %v892_v62 = vrot.slane %v864_v25, %v1802_v33 }
 0x472   : > { %v950_v48 = vadd.f32 %v949_v44, %v948_v18  ;;  %v945_v19 = vadd.f32 %v944_v55, %v943_v10 }
 0x473   : > { %v955_v8 = vsel %vm318_vm0, %v929_v16, 0.0  ;;  %v909_v4 = vsel %vm636_vm1, %v884_v12, %v880_v54 }
 0x474   : > { %v956_v45 = vrot.slane %v955_v8, 4  ;;  %v867_v5 = vpop.permute.xlu0 %866  ;;  %v951_v61 = vrot.slane %v950_v48, 2  ;;  %v910_v20 = vsel %vm638_vm2, %v888_v56, %v909_v4  ;;  %v946_v59 = vrot.slane %v945_v19, 1 }
 0x475   : > { %v930_v46 = vmul.f32 %v867_v5, %v1739_v7  ;;  %v937_v7 = vrot.slane %v936_v47, 2  ;;  %v896_v2 = vrot.slane %v867_v5, %v1802_v33  ;;  %v911_v28 = vsel %vm640_vm3, %v892_v62, %v910_v20 }
 0x476   : > { %v957_v50 = vadd.f32 %v956_v45, %v955_v8  ;;  %v952_v27 = vadd.f32 %v951_v61, %v950_v48 }
 0x477   : > { %v962_v49 = vsel %vm318_vm0, %v930_v46, 0.0  ;;  %v938_v24 = vadd.f32 %v937_v7, %v936_v47  ;;  %v912_v34 = vsel %vm642_vm4, %v896_v2, %v911_v28 }
 0x478   : > { %v963_v51 = vrot.slane %v962_v49, 4  ;;  %v870_v52 = vpop.permute.xlu0 %869  ;;  %v958_v1 = vrot.slane %v957_v50, 2  ;;  %v953_v38 = vrot.slane %v952_v27, 1 }
 0x479   : > { %v931_v53 = vmul.f32 %v870_v52, %v1747_v9  ;;  %v900_v14 = vrot.slane %v870_v52, %v1802_v33  ;;  %v939_v40 = vrot.slane %v938_v24, 1 }
 0x47a   : > { %v964_v60 = vadd.f32 %v963_v51, %v962_v49  ;;  %v959_v32 = vadd.f32 %v958_v1, %v957_v50  ;;  %v954_v43 = vadd.f32 %v953_v38, %v952_v27 }
 0x47b   : > { %v969_v63 = vsel %vm318_vm0, %v931_v53, 0.0  ;;  %v913_v30 = vsel %vm644_vm5, %v900_v14, %v912_v34  ;;  %v940_v44 = vadd.f32 %v939_v40, %v938_v24 }
 0x47c   : > { %v970_v3 = vrot.slane %v969_v63, 4  ;;  %v873_v9 = vpop.permute.xlu0 %872  ;;  %v965_v6 = vrot.slane %v964_v60, 2  ;;  %v960_v21 = vrot.slane %v959_v32, 1 }
 0x47d   : > { %v932_v17 = vmul.f32 %v873_v9, %v1753_v11  ;;  %v904_v23 = vrot.slane %v873_v9, %v1802_v33 }
 0x47e   : > { %v971_v22 = vadd.f32 %v970_v3, %v969_v63  ;;  %v966_v11 = vadd.f32 %v965_v6, %v964_v60  ;;  %v961_v8 = vadd.f32 %v960_v21, %v959_v32 }
 0x47f   : > { %v976_v29 = vsel %vm318_vm0, %v932_v17, 0.0  ;;  %v914_v37 = vsel %vm646_vm6, %v904_v23, %v913_v30 }
 0x480   : > { %v972_v35 = vrot.slane %v971_v22, 2  ;;  %v977_v26 = vrot.slane %v976_v29, 4  ;;  %v876_v57 = vpop.permute.xlu0 %875  ;;  %v967_v25 = vrot.slane %v966_v11, 1 }
 0x481   : > { %v908_v58 = vrot.slane %v876_v57, %v1802_v33  ;;  %v933_v31 = vmul.f32 %v876_v57, %v1767_v13  ;;  %v947_v33 = vadd.f32 %v946_v59, %v945_v19 }
 0x482   : > { %v973_v36 = vadd.f32 %v972_v35, %v971_v22  ;;  %v978_v0 = vadd.f32 %v977_v26, %v976_v29  ;;  %v968_v46 = vadd.f32 %v967_v25, %v966_v11 }
 0x483   : > { %v915_v39 = vsel %vm648_vm7, %v908_v58, %v914_v37  ;;  %v983_v15 = vsel %vm318_vm0, %v933_v31, 0.0  ;;  %v998_v10 = vsel %vm636_vm1, %v947_v33, %v940_v44 }
 0x484   : > { %v979_v41 = vrot.slane %v978_v0, 2  ;;  %917 = vst.msk [vmem:[%s305_s13] sm:$0xff] %vm651_vm8, %v915_v39  ;;  %v984_v18 = vrot.slane %v983_v15, 4  ;;  %v974_v16 = vrot.slane %v973_v36, 1  ;;  %v999_v49 = vsel %vm638_vm2, %v954_v43, %v998_v10 }
 0x485   : > { %v1000_v51 = vsel %vm640_vm3, %v961_v8, %v999_v49 }
 0x486   : > { %v980_v13 = vadd.f32 %v979_v41, %v978_v0  ;;  %v985_v42 = vadd.f32 %v984_v18, %v983_v15  ;;  %v975_v47 = vadd.f32 %v974_v16, %v973_v36  ;;  %v1001_v12 = vsel %vm642_vm4, %v968_v46, %v1000_v51 }
 0x488   : > { %v981_v45 = vrot.slane %v980_v13, 1  ;;  %v986_v5 = vrot.slane %v985_v42, 2  ;;  %v1002_v53 = vsel %vm644_vm5, %v975_v47, %v1001_v12 }
 0x48a   : > { %v987_v48 = vadd.f32 %v986_v5, %v985_v42  ;;  %v982_v50 = vadd.f32 %v981_v45, %v980_v13 }
 0x48c   : > { %v988_v52 = vrot.slane %v987_v48, 1  ;;  %v1003_v55 = vsel %vm646_vm6, %v982_v50, %v1002_v53 }
 0x48e   : > { %v989_v54 = vadd.f32 %v988_v52, %v987_v48 }
 0x490   : > { %v1004_v56 = vsel %vm648_vm7, %v989_v54, %v1003_v55 }
 0x491   : > { %1006 = vst.msk [vmem:[%s294_s23] sm:$0xff] %vm318_vm0, %v1004_v56 }
 0x492   : > { %1431 = shalt.err (!%p1428_p6)
}
 0x493   : > { %s1432_s8 = scalar_lea.hbm %s1925_s6, 128  ;;  %s1436_s12 = scalar_lea.hbm %s1975_s4, 256 }
 0x494   : > { %p1433_p8 = scmp.ne.s32.totalorder %s1925_s6, %s1432_s8  ;;  %p1437_p11 = scmp.lt.u32.totalorder %s1925_s6, %s1975_s4 }
 0x495   : > { %p1438_p0 = scmp.lt.u32.totalorder %s1436_s12, %s1432_s8  ;;  %p1440_p13 = scmp.lt.u32.totalorder %s1432_s8, %s1925_s6 }
 0x496   : > { %p1434_p4 = pnand %p1433_p8, %p1998_p3 }
 0x497   : > { %p1439_p10 = por %p1438_p0, %p1437_p11 }
 0x498   : > { %p1435_p12 = pneg %p1434_p4 }
 0x499   : > { %p1441_p7 = por %p1440_p13, %p1439_p10 }
 0x49b   : > { %p1442_p9 = pnand %p1441_p7, %p1435_p12 }
 0x49d   : > { %1445 = shalt.err (!%p1442_p9)
}
 0x49e   : > { %1235 = dma.vmem_to_hbm [thread:$0]  (%p1998_p3), %s1927_s27, 128, %s1925_s6, %s1008_s22  }
 0x49f PF: > { %s1040_s29 = sand.u32 1, %s1480_s18   ;;  %p1999_p1 = scmp.ne.s32.totalorder %s1984_s25, 0 }
 0x4a0   : > { %p2000_p5 = scmp.ge.s32.totalorder %s1492_s21, 2  ;;  %s1041_s7 = scalar_lea.sflag [#allocation4], %s1040_s29 }
 0x4a2   : > { %p1249_p2 = pnand %p2000_p5, %p1999_p1 }
 0x4a4   : > { %1475 = dma.done.wait (!%p1249_p2), %s1041_s7, 128  }
 0x4a5   : > { %1477 = vsyncadd (!%p1249_p2), %s1041_s7, 4294967168  ;;  %s2001_s13 = sld [smem:[#allocation13_spill]]  ;;  %p22_p6 = scmp.ge.s32.totalorder %s1588_s30, 4  }
 0x4a6   : > { %s2002_s18 = smov %s1484_s19  ;;  %s2003_s19 = smov %s1488_s20 }
 0x4a7   : > { %s2005_s21 = smov %s1588_s30  ;;  %24 = sbr.rel (!%p22_p6) target bundleno = 10 (0xa), region = 110 }
 0x4ab   : > { %s2004_s20 = smov %s2001_s13 }
 0x4ae   :  { %1053 = vsyncpa [#allocation3], 1 }
 0x4af   :  { %1055 = vsyncpa [#allocation3 + $0x1], 1 }
 0x4b0   :  { %1056 = vsyncpa [#allocation6], 1 }
 0x4b1   :  { %1058 = vsyncpa [#allocation6 + $0x1], 1 }
 0x4b2   :  { %1059 = vsyncpa [#allocation4], 1 }
 0x4b3   :  { %1061 = vsyncpa [#allocation4 + $0x1], 1 }

</bundles_post_ra>
